<compile_context>
chip_gen: v5e
topology: v5e:2x2
jax: 0.10.0
libtpu: 0.0.40
codegen_flags: <defaults>
</compile_context>

<pallas_src>
import math
import jax
import jax.numpy as jnp
from jax.scipy.special import erf as _erf_ref
from jax.experimental import pallas as pl
from jax.experimental.pallas import tpu as pltpu


_INV_SQRT2 = 1.0 / math.sqrt(2.0)


def _erf_poly(x):
    # Abramowitz & Stegun 7.1.26, |abs err| < 1.5e-7: only exp/mul/add/select,
    # all VPU/EUP-friendly and guaranteed to lower in Mosaic.
    a1, a2, a3, a4, a5 = (0.254829592, -0.284496736, 1.421413741,
                          -1.453152027, 1.061405429)
    p = 0.3275911
    ax = jnp.abs(x)
    t = 1.0 / (1.0 + p * ax)
    poly = ((((a5 * t + a4) * t + a3) * t + a2) * t + a1) * t
    y = 1.0 - poly * jnp.exp(-ax * ax)
    return jnp.where(x < 0, -y, y)


def _gelu_exact(x):
    # torch nn.GELU() default: 0.5 * x * (1 + erf(x / sqrt(2)))
    return 0.5 * x * (1.0 + _erf_poly(x * _INV_SQRT2))


def _mlp_kernel(x_ref, w1_ref, b1_ref, w2_ref, b2_ref, o_ref):
    # x_ref: (tm, H) bf16 token tile; w1/w2 bf16 (resident); biases f32.
    # Both matmuls hit the MXU with bf16 inputs and f32 accumulation.
    h = jnp.dot(x_ref[...], w1_ref[...], preferred_element_type=jnp.float32)
    h = _gelu_exact(h + b1_ref[...])                       # f32 bias + GELU
    y = jnp.dot(h.astype(jnp.bfloat16), w2_ref[...],
                preferred_element_type=jnp.float32) + b2_ref[...]
    # Dropout == identity in eval mode (see TODO in header).
    o_ref[...] = y.astype(o_ref.dtype)


def _choose_tm(M, block_m):
    """Row-tile size.

    Multiples of 256 satisfy both the 256-wide v6e/v7x MXU and the 128-wide
    v5e MXU; >=2 row tiles let dimension_semantics=("parallel",) shard the
    grid across v7x's two TensorCores.  A full-extent block (tm == M) is
    always layout-legal regardless of the (8, 128) divisibility rule.
    """
    if M <= block_m:
        half = M // 2
        if half >= 256 and half % 256 == 0:
            return half          # two aligned tiles -> both v7x TCs busy
        return M                 # single full-extent block
    return block_m               # partial last block handled by masked stores


def mlp(x, w1, b1, w2, b2, *, block_m=512):
    """x: (B, S, H); w1: (H, I); b1: (1, I); w2: (I, H); b2: (1, H).

    Returns (B, S, H) in x.dtype — Linear -> GELU(exact) -> Linear ->
    Dropout(eval).  Matmuls run with bf16 MXU inputs and f32 accumulation."""
    B, S, H = x.shape
    I = w1.shape[1]
    M = B * S

    # Flatten tokens into one lane-dense (M, H) slab; cast MXU inputs to bf16
    # in the wrapper so HBM traffic and resident-weight VMEM are halved.
    x2 = x.reshape(M, H).astype(jnp.bfloat16)
    w1b = w1.astype(jnp.bfloat16)
    w2b = w2.astype(jnp.bfloat16)
    b1f = b1.astype(jnp.float32)
    b2f = b2.astype(jnp.float32)

    tm = _choose_tm(M, block_m)
    grid = (pl.cdiv(M, tm),)     # no pad: partial last tile is masked on store

    out = pl.pallas_call(
        _mlp_kernel,
        out_shape=jax.ShapeDtypeStruct((M, H), x.dtype),
        grid_spec=pltpu.PrefetchScalarGridSpec(
            num_scalar_prefetch=0,
            grid=grid,
            in_specs=[
                pl.BlockSpec((tm, H), lambda i: (i, 0)),   # token tile (bf16)
                pl.BlockSpec((H, I), lambda i: (0, 0)),    # W1 (bf16, resident)
                pl.BlockSpec((1, I), lambda i: (0, 0)),    # b1 (f32)
                pl.BlockSpec((I, H), lambda i: (0, 0)),    # W2 (bf16, resident)
                pl.BlockSpec((1, H), lambda i: (0, 0)),    # b2 (f32)
            ],
            out_specs=pl.BlockSpec((tm, H), lambda i: (i, 0)),
        ),
        compiler_params=pltpu.CompilerParams(
            # v7x: shard row tiles over its 2 TensorCores.
            dimension_semantics=("parallel",),
            # Above v5e's 16 MiB default scoped VMEM (bf16 ViT-Base weights,
            # double-buffered, ~19 MB) and under v7x's 64 MiB physical VMEM.
            vmem_limit_bytes=48 * 1024 * 1024,
        ),
    )(x2, w1b, b1f, w2b, b2f)

    return out.reshape(B, S, H)


def _torch_linear_init(key, in_dim, out_dim):
    """nn.Linear init: uniform(-1/sqrt(in), 1/sqrt(in)); returns W^T and b."""
    kw, kb = jax.random.split(key)
    bound = 1.0 / math.sqrt(in_dim)
    w = jax.random.uniform(kw, (out_dim, in_dim), jnp.float32, -bound, bound).T
    b = jax.random.uniform(kb, (1, out_dim), jnp.float32, -bound, bound)
    return w, b


def _reference(x, w1, b1, w2, b2):
    # Mirrors the kernel's mixed-precision policy (bf16 MXU inputs, f32
    # accumulation / bias / GELU, bf16 re-cast before the second matmul), with
    # torch's exact-erf GELU.
    xb = x.astype(jnp.bfloat16).astype(jnp.float32)
    w1b = w1.astype(jnp.bfloat16).astype(jnp.float32)
    w2b = w2.astype(jnp.bfloat16).astype(jnp.float32)
    h = jnp.einsum("bsh,hi->bsi", xb, w1b,
                   precision=jax.lax.Precision.HIGHEST) + b1
    h = 0.5 * h * (1.0 + _erf_ref(h * _INV_SQRT2))
    hb = h.astype(jnp.bfloat16).astype(jnp.float32)
    return jnp.einsum("bsi,ih->bsh", hb, w2b,
                      precision=jax.lax.Precision.HIGHEST) + b2


if __name__ == "__main__":
    # batch=2, seq=8, hidden_dim=32, interm_dim=4*hidden=128 (typical ViT ratio)
    B, S, H, I = 2, 8, 32, 128
    key = jax.random.PRNGKey(0)
    kx, k1, k2 = jax.random.split(key, 3)

    x = jax.random.normal(kx, (B, S, H), jnp.float32)
    w1, b1 = _torch_linear_init(k1, H, I)
    w2, b2 = _torch_linear_init(k2, I, H)

    y = mlp(x, w1, b1, w2, b2)
    jax.block_until_ready(y)

    y_ref = _reference(x, w1, b1, w2, b2)
    assert y.shape == (B, S, H)
    # Tolerance absorbs the 1.5e-7 erf-polynomial error and MXU vs XLA f32
    # accumulation-order differences (the bf16 input policy itself is mirrored
    # in the reference).
    assert jnp.allclose(y, y_ref, atol=1e-4, rtol=1e-4), \
        float(jnp.max(jnp.abs(y - y_ref)))

    print("KERNEL_OK")
</pallas_src>

<mosaic_0001>
module attributes {stable_mosaic.version = 11 : i64} {
  func.func @_mlp_kernel(%arg0: i32, %arg1: memref<16x32xbf16, #tpu.memory_space<vmem>>, %arg2: memref<32x128xbf16, #tpu.memory_space<vmem>>, %arg3: memref<1x128xf32, #tpu.memory_space<vmem>>, %arg4: memref<128x32xbf16, #tpu.memory_space<vmem>>, %arg5: memref<1x32xf32, #tpu.memory_space<vmem>>, %arg6: memref<16x32xf32, #tpu.memory_space<vmem>>) attributes {dimension_semantics = [#tpu.dimension_semantics<parallel>], iteration_bounds = array<i64: 1>, scalar_prefetch = 0 : i64, scratch_operands = 0 : i64, tpu.core_type = #tpu.core_type<tc>, window_params = [{transform_indices = @transform_0, window_bounds = array<i64: 16, 32>}, {pipeline_mode = #tpu.pipeline_mode<synchronous>, transform_indices = @transform_1, window_bounds = array<i64: 32, 128>}, {pipeline_mode = #tpu.pipeline_mode<synchronous>, transform_indices = @transform_2, window_bounds = array<i64: 1, 128>}, {pipeline_mode = #tpu.pipeline_mode<synchronous>, transform_indices = @transform_3, window_bounds = array<i64: 128, 32>}, {pipeline_mode = #tpu.pipeline_mode<synchronous>, transform_indices = @transform_4, window_bounds = array<i64: 1, 32>}, {transform_indices = @transform_5, window_bounds = array<i64: 16, 32>}]} {
    %c0 = arith.constant 0 : index
    %c0_0 = arith.constant 0 : index
    %0 = vector.load %arg1[%c0, %c0_0] : memref<16x32xbf16, #tpu.memory_space<vmem>>, vector<16x32xbf16>
    %c0_1 = arith.constant 0 : index
    %c0_2 = arith.constant 0 : index
    %1 = vector.load %arg2[%c0_1, %c0_2] : memref<32x128xbf16, #tpu.memory_space<vmem>>, vector<32x128xbf16>
    %cst = arith.constant dense<0.000000e+00> : vector<16x128xf32>
    %2 = tpu.matmul %0, %1, %cst {dimension_numbers = #tpu.dot_dimension_numbers<[1], [0], [0], [1], [0, 0, 1, 1], [], []>} : vector<16x32xbf16>, vector<32x128xbf16>, vector<16x128xf32> -> vector<16x128xf32>
    %c0_3 = arith.constant 0 : index
    %c0_4 = arith.constant 0 : index
    %3 = vector.load %arg3[%c0_3, %c0_4] : memref<1x128xf32, #tpu.memory_space<vmem>>, vector<1x128xf32>
    %4 = vector.broadcast %3 : vector<1x128xf32> to vector<16x128xf32>
    %5 = arith.addf %2, %4 : vector<16x128xf32>
    %cst_5 = arith.constant 5.000000e-01 : f32
    %6 = vector.broadcast %cst_5 : f32 to vector<16x128xf32>
    %7 = arith.mulf %6, %5 : vector<16x128xf32>
    %cst_6 = arith.constant 0.707106769 : f32
    %8 = vector.broadcast %cst_6 : f32 to vector<16x128xf32>
    %9 = arith.mulf %5, %8 : vector<16x128xf32>
    %10 = math.absf %9 : vector<16x128xf32>
    %cst_7 = arith.constant 0.327591091 : f32
    %11 = vector.broadcast %cst_7 : f32 to vector<16x128xf32>
    %12 = arith.mulf %11, %10 : vector<16x128xf32>
    %cst_8 = arith.constant 1.000000e+00 : f32
    %13 = vector.broadcast %cst_8 : f32 to vector<16x128xf32>
    %14 = arith.addf %13, %12 : vector<16x128xf32>
    %cst_9 = arith.constant 1.000000e+00 : f32
    %15 = vector.broadcast %cst_9 : f32 to vector<16x128xf32>
    %16 = arith.divf %15, %14 : vector<16x128xf32>
    %cst_10 = arith.constant 1.06140542 : f32
    %17 = vector.broadcast %cst_10 : f32 to vector<16x128xf32>
    %18 = arith.mulf %17, %16 : vector<16x128xf32>
    %cst_11 = arith.constant -1.45315206 : f32
    %19 = vector.broadcast %cst_11 : f32 to vector<16x128xf32>
    %20 = arith.addf %18, %19 : vector<16x128xf32>
    %21 = arith.mulf %20, %16 : vector<16x128xf32>
    %cst_12 = arith.constant 1.42141378 : f32
    %22 = vector.broadcast %cst_12 : f32 to vector<16x128xf32>
    %23 = arith.addf %21, %22 : vector<16x128xf32>
    %24 = arith.mulf %23, %16 : vector<16x128xf32>
    %cst_13 = arith.constant -0.284496725 : f32
    %25 = vector.broadcast %cst_13 : f32 to vector<16x128xf32>
    %26 = arith.addf %24, %25 : vector<16x128xf32>
    %27 = arith.mulf %26, %16 : vector<16x128xf32>
    %cst_14 = arith.constant 0.254829586 : f32
    %28 = vector.broadcast %cst_14 : f32 to vector<16x128xf32>
    %29 = arith.addf %27, %28 : vector<16x128xf32>
    %30 = arith.mulf %29, %16 : vector<16x128xf32>
    %cst_15 = arith.constant 0.000000e+00 : f32
    %31 = vector.broadcast %cst_15 : f32 to vector<16x128xf32>
    %32 = arith.subf %31, %10 : vector<16x128xf32>
    %33 = arith.mulf %32, %10 : vector<16x128xf32>
    %34 = math.exp %33 : vector<16x128xf32>
    %35 = arith.mulf %30, %34 : vector<16x128xf32>
    %cst_16 = arith.constant 1.000000e+00 : f32
    %36 = vector.broadcast %cst_16 : f32 to vector<16x128xf32>
    %37 = arith.subf %36, %35 : vector<16x128xf32>
    %cst_17 = arith.constant 0.000000e+00 : f32
    %38 = vector.broadcast %cst_17 : f32 to vector<16x128xf32>
    %39 = arith.cmpf olt, %9, %38 : vector<16x128xf32>
    %cst_18 = arith.constant 0.000000e+00 : f32
    %40 = vector.broadcast %cst_18 : f32 to vector<16x128xf32>
    %41 = arith.subf %40, %37 : vector<16x128xf32>
    %42 = arith.select %39, %41, %37 : vector<16x128xi1>, vector<16x128xf32>
    %cst_19 = arith.constant 1.000000e+00 : f32
    %43 = vector.broadcast %cst_19 : f32 to vector<16x128xf32>
    %44 = arith.addf %43, %42 : vector<16x128xf32>
    %45 = arith.mulf %7, %44 : vector<16x128xf32>
    %46 = arith.truncf %45 : vector<16x128xf32> to vector<16x128xbf16>
    %c0_20 = arith.constant 0 : index
    %c0_21 = arith.constant 0 : index
    %47 = vector.load %arg4[%c0_20, %c0_21] : memref<128x32xbf16, #tpu.memory_space<vmem>>, vector<128x32xbf16>
    %cst_22 = arith.constant dense<0.000000e+00> : vector<16x32xf32>
    %48 = tpu.matmul %46, %47, %cst_22 {dimension_numbers = #tpu.dot_dimension_numbers<[1], [0], [0], [1], [0, 0, 1, 1], [], []>} : vector<16x128xbf16>, vector<128x32xbf16>, vector<16x32xf32> -> vector<16x32xf32>
    %c0_23 = arith.constant 0 : index
    %c0_24 = arith.constant 0 : index
    %49 = vector.load %arg5[%c0_23, %c0_24] : memref<1x32xf32, #tpu.memory_space<vmem>>, vector<1x32xf32>
    %50 = vector.broadcast %49 : vector<1x32xf32> to vector<16x32xf32>
    %51 = arith.addf %48, %50 : vector<16x32xf32>
    %c0_25 = arith.constant 0 : index
    %c0_26 = arith.constant 0 : index
    %52 = vector.load %arg6[%c0_25, %c0_26] : memref<16x32xf32, #tpu.memory_space<vmem>>, vector<16x32xf32>
    tpu.vector_store %arg6[%c0_25, %c0_26], %51 {strides = array<i32>} : memref<16x32xf32, #tpu.memory_space<vmem>>, vector<16x32xf32>,
    return
  }
  func.func @transform_0(%arg0: i32) -> (i32, i32) {
    %c0_i32 = arith.constant 0 : i32
    %c0_i32_0 = arith.constant 0 : i32
    return %arg0, %c0_i32 : i32, i32
  }
  func.func @transform_1(%arg0: i32) -> (i32, i32) {
    %c0_i32 = arith.constant 0 : i32
    %c0_i32_0 = arith.constant 0 : i32
    %c0_i32_1 = arith.constant 0 : i32
    return %c0_i32, %c0_i32_0 : i32, i32
  }
  func.func @transform_2(%arg0: i32) -> (i32, i32) {
    %c0_i32 = arith.constant 0 : i32
    %c0_i32_0 = arith.constant 0 : i32
    %c0_i32_1 = arith.constant 0 : i32
    return %c0_i32, %c0_i32_0 : i32, i32
  }
  func.func @transform_3(%arg0: i32) -> (i32, i32) {
    %c0_i32 = arith.constant 0 : i32
    %c0_i32_0 = arith.constant 0 : i32
    %c0_i32_1 = arith.constant 0 : i32
    return %c0_i32, %c0_i32_0 : i32, i32
  }
  func.func @transform_4(%arg0: i32) -> (i32, i32) {
    %c0_i32 = arith.constant 0 : i32
    %c0_i32_0 = arith.constant 0 : i32
    %c0_i32_1 = arith.constant 0 : i32
    return %c0_i32, %c0_i32_0 : i32, i32
  }
  func.func @transform_5(%arg0: i32) -> (i32, i32) {
    %c0_i32 = arith.constant 0 : i32
    %c0_i32_0 = arith.constant 0 : i32
    return %arg0, %c0_i32 : i32, i32
  }
}

</mosaic_0001>

<bundles_post_ra>
// kernel: tpu_custom_call.1
= control target key start
LH: loop header
LB: loop body
LE: loop exit
PB: predicated region body
PF: predicated region fallthrough
CT: control target
= control target key end

     0   :  { %s439_s0 = inlined_call_operand.vmem [shape: bf16[16,32], index: 0, kind: input, shape index: {}]   ;;  %s440_s1 = inlined_call_operand.vmem [shape: bf16[32,128], index: 1, kind: input, shape index: {}]   ;;  %s441_s2 = inlined_call_operand.vmem [shape: f32[1,128], index: 2, kind: input, shape index: {}]   ;;  %s442_s3 = inlined_call_operand.vmem [shape: bf16[128,32], index: 3, kind: input, shape index: {}]   ;;  %s443_s4 = inlined_call_operand.vmem [shape: f32[1,32], index: 4, kind: input, shape index: {}]   ;;  %s444_s5 = inlined_call_operand.hbm [shape: f32[16,32], index: 5, kind: output, shape index: {}]  }
   0x1   :  { %v297_v0 = vld [vmem:[%s440_s1 + $0x8] sm:$0xff]  ;;  %v296_v1 = vld [vmem:[%s440_s1] sm:$0xff] }
   0x2   :  { %59 = vmatpush.bf16.msra.mxu0 %v297_v0 }
   0x3   :  { %10 = vsyncpa [#allocation3], 0  ;;  %v295_v2 = vld [vmem:[%s439_s0] sm:$0xff]  ;;  %vm49_vm0 = vcmask 261120   ;;  %v305_v4 = vld [vmem:[%s442_s3 + $0x38] sm:$0xff]  ;;  %s345_s15 = smov [#allocation2]  }
   0x4   :  { %v309_v3 = vld [vmem:[%s441_s2] ss:$0 sm:$0xff]  ;;  %216 = vmatpush.bf16.msra.mxu1 %v305_v4  ;;  %v304_v7 = vld [vmem:[%s442_s3 + $0x30] sm:$0xff]  ;;  %v303_v10 = vld [vmem:[%s442_s3 + $0x28] sm:$0xff]  ;;  %s236_s16 = sshll.u32 %s345_s15, 4  ;;  %s238_s19 = sshll.u32 %s444_s5, 4  ;;  %s237_s16 = int_to_ptr.vmem [resolvable:$true] %s236_s16  ;;  %s239_s19 = int_to_ptr.hbm [resolvable:$true] %s238_s19 }
   0x5   :  { %v302_v15 = vld [vmem:[%s442_s3 + $0x20] sm:$0xff]  ;;  %v301_v17 = vld [vmem:[%s442_s3 + $0x18] sm:$0xff]  ;;  %v300_v21 = vld [vmem:[%s442_s3 + $0x10] sm:$0xff]  ;;  %s346_s20 = smov 128   ;;  %s347_s21 = smov 8  }
   0x6   :  { %60 = vmatpush.bf16.msra.mxu0 %v296_v1  ;;  %v299_v26 = vld [vmem:[%s442_s3 + $0x8] sm:$0xff]  ;;  %v298_v31 = vld [vmem:[%s442_s3] sm:$0xff] }
   0x8   :  { %217 = vmatpush.bf16.msra.mxu1 %v304_v7 }
   0x9   :  { %262 = vmatmul.msk.bf16.vlgmr.msra.gmra.mxu0 %vm49_vm0, %v295_v2 }
   0xc   :  { %218 = vmatpush.bf16.msra.mxu1 %v303_v10 }
  0x10   :  { %219 = vmatpush.bf16.msra.mxu1 %v302_v15 }
  0x14   :  { %220 = vmatpush.bf16.msra.mxu1 %v301_v17 }
  0x18   :  { %221 = vmatpush.bf16.msra.mxu1 %v300_v21 }
  0x1c   :  { %222 = vmatpush.bf16.msra.mxu1 %v299_v26 }
  0x20   :  { %223 = vmatpush.bf16.msra.mxu1 %v298_v31 }
  0x86   :  { %v62_v5 = vpop.f32.mrf.mxu0 }
  0x87   :  { %v394_v6 = vadd.f32 %v309_v3, %v62_v5 }
  0x89   :  { %v400_v8 = vmul.f32 0.70710677, %v394_v6 }
  0x8b   :  { %v71_v9 = vand.u32 2147483647, %v400_v8  ;;  %vm137_vm9 = vcmp.lt.f32.partialorder %v400_v8, 0.0  ;;  %v310_v8 = vld [vmem:[%s443_s4] ss:$0 sm:$0xff] }
  0x8d   :  { %v73_v11 = vmul.f32 0.3275911, %v71_v9  ;;  %v125_v34 = vsub.f32 0.0, %v71_v9 }
  0x8e   :  { %v64_v12 = vpop.f32.mrf.mxu0 }
  0x8f   :  { %v75_v13 = vadd.f32 1.0, %v73_v11  ;;  %v406_v14 = vadd.f32 %v309_v3, %v64_v12  ;;  %v127_v41 = vmul.f32 %v125_v34, %v71_v9 }
  0x91   :  { %311 = vrcp.f32 %v75_v13  ;;  %v412_v16 = vmul.f32 0.70710677, %v406_v14  ;;  %v88_v25 = vand.u32 2147483648, %v75_v13  ;;  %v86_v28 = vand.u32 2147483647, %v75_v13 }
  0x92   :  { %vm82_vm2 = vweird.f32 %v75_v13  ;;  %v129_v48 = vmul.f32 1.442695, %v127_v41 }
  0x93   :  { %v72_v18 = vand.u32 2147483647, %v412_v16  ;;  %v89_v30 = vor.u32 1.1754944e-38, %v88_v25  ;;  %vm87_vm4 = vcmp.eq.f32.partialorder %v86_v28, 8.507059e+37  ;;  %vm138_vm10 = vcmp.lt.f32.partialorder %v412_v16, 0.0 }
  0x95   :  { %v74_v19 = vmul.f32 0.3275911, %v72_v18  ;;  %v126_v50 = vsub.f32 0.0, %v72_v18 }
  0x97   :  { %v312_v20 = vpop.eup %311  ;;  %v76_v23 = vadd.f32 1.0, %v74_v19  ;;  %v128_v56 = vmul.f32 %v126_v50, %v72_v18  ;;  %v67_v19 = vmul.f32 0.5, %v394_v6 }
  0x98   :  { %v78_v22 = vmul.f32 %v312_v20, %v75_v13  ;;  %vm83_vm1 = vweird.f32 %v312_v20 }
  0x99   :  { %313 = vrcp.f32 %v76_v23  ;;  %vm84_vm3 = vmor %vm82_vm2, %vm83_vm1  ;;  %v103_v39 = vand.u32 2147483648, %v76_v23  ;;  %v101_v43 = vand.u32 2147483647, %v76_v23  ;;  %vm97_vm6 = vweird.f32 %v76_v23 }
  0x9a   :  { %v79_v24 = vsub.f32 1.0, %v78_v22  ;;  %315 = vpow2.f32 %v129_v48  ;;  %v131_v61 = vmul.f32 1.442695, %v128_v56 }
  0x9b   :  { %v104_v46 = vor.u32 1.1754944e-38, %v103_v39  ;;  %vm102_vm8 = vcmp.eq.f32.partialorder %v101_v43, 8.507059e+37 }
  0x9c   :  { %v80_v27 = vmul.f32 %v312_v20, %v79_v24  ;;  %317 = vpow2.f32 %v131_v61 }
  0x9e   :  { %v81_v29 = vadd.f32 %v312_v20, %v80_v27 }
  0x9f   :  { %v314_v32 = vpop.eup %313 }
  0xa0   :  { %v85_v33 = vsel %vm84_vm3, %v312_v20, %v81_v29  ;;  %v93_v35 = vmul.f32 %v314_v32, %v76_v23  ;;  %vm98_vm5 = vweird.f32 %v314_v32  ;;  %v316_v63 = vpop.eup %315  ;;  %v68_v20 = vmul.f32 0.5, %v406_v14 }
  0xa1   :  { %v90_v36 = vsel %vm87_vm4, %v89_v30, %v85_v33  ;;  %vm99_vm7 = vmor %vm97_vm6, %vm98_vm5 }
  0xa2   :  { %v107_v37 = vmul.f32 1.0614054, %v90_v36  ;;  %v94_v38 = vsub.f32 1.0, %v93_v35  ;;  %v318_v10 = vpop.eup %317 }
  0xa4   :  { %v109_v40 = vadd.f32 -1.4531521, %v107_v37  ;;  %v95_v42 = vmul.f32 %v314_v32, %v94_v38 }
  0xa6   :  { %v111_v44 = vmul.f32 %v109_v40, %v90_v36  ;;  %v96_v45 = vadd.f32 %v314_v32, %v95_v42 }
  0xa8   :  { %v113_v47 = vadd.f32 1.4214138, %v111_v44  ;;  %v100_v49 = vsel %vm99_vm7, %v314_v32, %v96_v45 }
  0xa9   :  { %v105_v51 = vsel %vm102_vm8, %v104_v46, %v100_v49 }
  0xaa   :  { %v115_v52 = vmul.f32 %v113_v47, %v90_v36  ;;  %v108_v53 = vmul.f32 1.0614054, %v105_v51 }
  0xac   :  { %v117_v54 = vadd.f32 -0.28449672, %v115_v52  ;;  %v110_v55 = vadd.f32 -1.4531521, %v108_v53 }
  0xae   :  { %v119_v57 = vmul.f32 %v117_v54, %v90_v36  ;;  %v112_v58 = vmul.f32 %v110_v55, %v105_v51 }
  0xb0   :  { %v121_v59 = vadd.f32 0.2548296, %v119_v57  ;;  %v114_v60 = vadd.f32 1.4214138, %v112_v58 }
  0xb2   :  { %v123_v62 = vmul.f32 %v121_v59, %v90_v36  ;;  %v116_v0 = vmul.f32 %v114_v60, %v105_v51 }
  0xb4   :  { %v133_v1 = vmul.f32 %v316_v63, %v123_v62  ;;  %v118_v2 = vadd.f32 -0.28449672, %v116_v0 }
  0xb6   :  { %v120_v3 = vmul.f32 %v118_v2, %v105_v51  ;;  %v135_v4 = vsub.f32 1.0, %v133_v1 }
  0xb8   :  { %v122_v5 = vadd.f32 0.2548296, %v120_v3  ;;  %v139_v9 = vsub.f32 0.0, %v135_v4 }
  0xba   :  { %v124_v7 = vmul.f32 %v122_v5, %v105_v51  ;;  %v141_v13 = vsel %vm137_vm9, %v139_v9, %v135_v4 }
  0xbb   :  { %v143_v17 = vadd.f32 1.0, %v141_v13 }
  0xbc   :  { %v134_v11 = vmul.f32 %v318_v10, %v124_v7 }
  0xbd   :  { %v145_v22 = vmul.f32 %v143_v17, %v67_v19 }
  0xbe   :  { %v136_v12 = vsub.f32 1.0, %v134_v11 }
  0xc0   :  { %v140_v15 = vsub.f32 0.0, %v136_v12 }
  0xc2   :  { %v142_v18 = vsel %vm138_vm10, %v140_v15, %v136_v12 }
  0xc3   :  { %v144_v21 = vadd.f32 1.0, %v142_v18 }
  0xc5   :  { %v146_v23 = vmul.f32 %v144_v21, %v68_v20 }
  0xc7   :  { %v147_v24 = vpack.c.bf16 %v146_v23, %v145_v22 }
  0xc9   :  { %224 = vmatmul.bf16.vlgmr.msra.gmra.mxu1 %v147_v24 }
 0x146   :  { %v225_v25 = vpop.f32.mrf.mxu1 }
 0x147   :  { %v226_v26 = vadd.f32 %v310_v8, %v225_v25 }
 0x149   :  { %230 = vst.msk [vmem:[#allocation2] sm:$0xff] %vm49_vm0, %v226_v26 }
 0x14e   :  { %v227_v6 = vpop.f32.mrf.mxu1 }
 0x14f   :  { %v228_v14 = vadd.f32 %v310_v8, %v227_v6 }
 0x151   :  { %231 = vst.msk [vmem:[#allocation2 + $0x8] sm:$0xff] %vm49_vm0, %v228_v14 }
 0x152   :  { %244 = dma.vmem_to_hbm [thread:$0]  %s237_s16, 256, %s239_s19, [#allocation3], %s346_s20, %s346_s20, %s347_s21  }
 0x153   :  { %343 = dma.done.wait [#allocation3], 256  }
 0x154   :  { %344 = vsyncadd [#allocation3], 4294967040 }
 0x155   :  { %249 = vsyncpa [#allocation3], 1 }

</bundles_post_ra>
